<compile_context>
chip_gen: v7x
topology: tpu7x:2x2x1
jax: 0.10.0
libtpu: 0.0.40
codegen_flags: <defaults>
</compile_context>

<pallas_src>
import functools

import jax
import jax.numpy as jnp
from jax import lax
from jax.experimental import pallas as pl
from jax.experimental.pallas import tpu as pltpu

_MIB = 1024 * 1024


def _pick_tile(dim, preferred):
    """Largest preferred tile that divides `dim`, else the full dimension."""
    for t in preferred:
        if dim % t == 0:
            return t
    return dim


def _main_footprint(tb, tk, D, itemsize):
    """Approximate VMEM bytes used by the main kernel at (tb, tk) tiles."""
    fp = 4 * tb * tk * itemsize                 # im + s tiles, double buffered
    fp += 2 * max(tb, 8) * 128 * 4              # (tb, 1) diag col, lane padded
    fp += 2 * 8 * max(tb, 128) * 4              # (1, tb) diag row, sublane padded
    fp += 2 * 8 * 128 * 4                       # (8, 128) output block
    if tk != D:
        fp += tb * tb * 4                       # f32 k-axis accumulator scratch
    return fp


def _select_tiles(B, D, itemsize, budget_bytes, force_tb=None, force_tk=None):
    """Pick (tb, tk): largest tb first, prefer tk=D, subject to VMEM budget."""
    if force_tb is not None and force_tk is not None:
        return force_tb, force_tk
    tb_cands = ([force_tb] if force_tb is not None
                else ([t for t in (1024, 512, 256, 128) if B % t == 0] or [B]))
    tk_cands = ([force_tk] if force_tk is not None
                else ([D] + [t for t in (512, 256, 128) if D % t == 0 and t != D]))
    for tb in tb_cands:
        for tk in tk_cands:
            if _main_footprint(tb, tk, D, itemsize) <= budget_bytes:
                return tb, tk
    return tb_cands[-1], tk_cands[-1]


# ---------------------------------------------------------------------------
# Pairwise diagonal: diag[r] = sum_d im[r, d] * s[r, d]   (O(B*D), VPU only)
# ---------------------------------------------------------------------------
def _pairwise_diag_kernel(im_ref, s_ref, diag_ref):
    @pl.when(pl.program_id(1) == 0)
    def _init():
        diag_ref[...] = jnp.zeros_like(diag_ref)

    diag_ref[...] += jnp.sum(
        im_ref[...].astype(jnp.float32) * s_ref[...].astype(jnp.float32),
        axis=1, keepdims=True)


def _pairwise_diag(im, s):
    B, D = im.shape
    tb = _pick_tile(B, (256, 128))
    tk = _pick_tile(D, (512, 256, 128))
    return pl.pallas_call(
        _pairwise_diag_kernel,
        out_shape=jax.ShapeDtypeStruct((B, 1), jnp.float32),
        grid_spec=pltpu.PrefetchScalarGridSpec(
            num_scalar_prefetch=0,
            grid=(B // tb, D // tk),
            in_specs=[
                pl.BlockSpec((tb, tk), lambda i, k: (i, k)),
                pl.BlockSpec((tb, tk), lambda i, k: (i, k)),
            ],
            # Same output block across the k axis -> resident accumulator.
            out_specs=pl.BlockSpec((tb, 1), lambda i, k: (i, 0)),
        ),
        compiler_params=pltpu.CompilerParams(
            dimension_semantics=("parallel", "arbitrary")),
    )(im, s)


# ---------------------------------------------------------------------------
# Shared hinge epilogue for one (tb, tb) score tile.
# ---------------------------------------------------------------------------
def _hinge_epilogue(out_ref, scores, dcol, drow, i, j, margin):
    # Hoist the margin add; it is shared by both hinge terms.
    ms = scores + margin
    hinge = jnp.maximum(ms - dcol, 0.0) + jnp.maximum(ms - drow, 0.0)

    # Each (i, j) tile owns a private (8, 128) output block; the partial sum
    # lives at [0, 0], remaining lanes are zero.
    r8 = lax.broadcasted_iota(jnp.int32, (8, 128), 0)
    c128 = lax.broadcasted_iota(jnp.int32, (8, 128), 1)
    sel = (r8 == 0) & (c128 == 0)

    # Only the gb diagonal tiles pay for the O(tb^2) mask work.
    @pl.when(i == j)
    def _diag_block():
        tb = scores.shape[0]
        r = lax.broadcasted_iota(jnp.int32, (tb, tb), 0)
        c = lax.broadcasted_iota(jnp.int32, (tb, tb), 1)
        tile_total = jnp.sum(jnp.where(r != c, hinge, 0.0))
        out_ref[...] = jnp.where(sel, tile_total, 0.0)

    @pl.when(i != j)
    def _off_block():
        out_ref[...] = jnp.where(sel, jnp.sum(hinge), 0.0)


# ---------------------------------------------------------------------------
# Main kernels.
# ---------------------------------------------------------------------------
def _contrastive_tile_kernel_fused(im_ref, s_ref, dcol_ref, drow_ref, out_ref,
                                   *, margin):
    # tk == D: one MXU contraction per tile, no accumulator scratch, no k axis.
    i = pl.program_id(0)
    j = pl.program_id(1)
    scores = lax.dot_general(
        im_ref[...], s_ref[...],
        dimension_numbers=(((1,), (1,)), ((), ())),   # im @ s.T, no s copy
        preferred_element_type=jnp.float32)
    _hinge_epilogue(out_ref, scores, dcol_ref[...], drow_ref[...], i, j, margin)


def _contrastive_tile_kernel_acc(im_ref, s_ref, dcol_ref, drow_ref, out_ref,
                                 acc_ref, *, margin):
    # Fallback when a full-D row panel does not fit VMEM: k-tiled accumulation.
    i = pl.program_id(0)
    j = pl.program_id(1)
    k = pl.program_id(2)

    @pl.when(k == 0)
    def _init():
        acc_ref[...] = jnp.zeros_like(acc_ref)

    acc_ref[...] += lax.dot_general(
        im_ref[...], s_ref[...],
        dimension_numbers=(((1,), (1,)), ((), ())),
        preferred_element_type=jnp.float32)

    @pl.when(k == pl.num_programs(2) - 1)
    def _epilogue():
        _hinge_epilogue(out_ref, acc_ref[...], dcol_ref[...], drow_ref[...],
                        i, j, margin)


def contrastive_loss(im, s, margin=0.2, block_b=None, block_k=None,
                     cast_to_bf16=False, vmem_budget_bytes=24 * _MIB):
    """im, s: (B, D) -> scalar f32 loss matching ContrastiveLoss.forward."""
    B, D = im.shape
    assert s.shape == (B, D), (im.shape, s.shape)

    if cast_to_bf16 and im.dtype != jnp.bfloat16:
        # Halves HBM traffic in a bandwidth-bound kernel; MXU runs native bf16.
        im = im.astype(jnp.bfloat16)
        s = s.astype(jnp.bfloat16)
    itemsize = jnp.dtype(im.dtype).itemsize

    tb, tk = _select_tiles(B, D, itemsize, vmem_budget_bytes,
                           force_tb=block_b, force_tk=block_k)
    assert B % tb == 0 and D % tk == 0, (B, D, tb, tk)
    gb, gk = B // tb, D // tk

    diag_col = _pairwise_diag(im, s)       # (B, 1) f32
    diag_row = diag_col.reshape(1, B)      # (1, B) f32 (layout only)

    # Raise the scoped VMEM limit so large tiles compile on v5e (16 MiB
    # default); 32 MiB equals the v6e/v7x defaults, so it is harmless there.
    footprint = _main_footprint(tb, tk, D, itemsize)
    vmem_limit = max(32 * _MIB, int(footprint * 1.3))

    bytes_main = (((gb + 1) if gk == 1 else 2 * gb) * B * D * itemsize
                  + 2 * gb * B * 4 + gb * gb * 8 * 128 * 4)
    ce = pl.CostEstimate(flops=2 * B * B * D + 8 * B * B,
                         transcendentals=0, bytes_accessed=bytes_main)

    margin = float(margin)
    out_shape = jax.ShapeDtypeStruct((gb * 8, gb * 128), jnp.float32)

    if gk == 1:
        # Fused path: j innermost so the im (i) row panel stays resident and is
        # streamed from HBM only once in total.
        partials = pl.pallas_call(
            functools.partial(_contrastive_tile_kernel_fused, margin=margin),
            out_shape=out_shape,
            grid_spec=pltpu.PrefetchScalarGridSpec(
                num_scalar_prefetch=0,
                grid=(gb, gb),
                in_specs=[
                    pl.BlockSpec((tb, D), lambda i, j: (i, 0)),   # im rows i
                    pl.BlockSpec((tb, D), lambda i, j: (j, 0)),   # s  rows j
                    pl.BlockSpec((tb, 1), lambda i, j: (i, 0)),   # diag, rows
                    pl.BlockSpec((1, tb), lambda i, j: (0, j)),   # diag, cols
                ],
                out_specs=pl.BlockSpec((8, 128), lambda i, j: (i, j)),
            ),
            compiler_params=pltpu.CompilerParams(
                dimension_semantics=("parallel", "parallel"),
                vmem_limit_bytes=vmem_limit),
            cost_estimate=ce,
        )(im, s, diag_col, diag_row)
    else:
        partials = pl.pallas_call(
            functools.partial(_contrastive_tile_kernel_acc, margin=margin),
            out_shape=out_shape,
            grid_spec=pltpu.PrefetchScalarGridSpec(
                num_scalar_prefetch=0,
                grid=(gb, gb, gk),
                in_specs=[
                    pl.BlockSpec((tb, tk), lambda i, j, k: (i, k)),
                    pl.BlockSpec((tb, tk), lambda i, j, k: (j, k)),
                    pl.BlockSpec((tb, 1), lambda i, j, k: (i, 0)),
                    pl.BlockSpec((1, tb), lambda i, j, k: (0, j)),
                ],
                out_specs=pl.BlockSpec((8, 128), lambda i, j, k: (i, j)),
                scratch_shapes=[pltpu.VMEM((tb, tb), jnp.float32)],
            ),
            compiler_params=pltpu.CompilerParams(
                dimension_semantics=("parallel", "parallel", "arbitrary"),
                vmem_limit_bytes=vmem_limit),
            cost_estimate=ce,
        )(im, s, diag_col, diag_row)

    # Final scalar reduce + the module's .div(im.shape[0] * s.shape[0]).
    return jnp.sum(partials) / (B * B)


def contrastive_loss_ref(im, s, margin=0.2):
    """Pure-JAX reference mirroring the PyTorch forward (f32-exact matmul)."""
    scores = jnp.dot(im.astype(jnp.float32), s.astype(jnp.float32).T,
                     precision=lax.Precision.HIGHEST)
    diag = jnp.diag(scores).reshape(-1, 1)
    cost_s = jnp.maximum(margin + scores - diag, 0.0)
    cost_im = jnp.maximum(margin + scores - diag.T, 0.0)
    mask = jnp.eye(scores.shape[0], dtype=bool)
    cost_s = jnp.where(mask, 0.0, cost_s)
    cost_im = jnp.where(mask, 0.0, cost_im)
    return (cost_s.sum() + cost_im.sum()) / (im.shape[0] * s.shape[0])


if __name__ == "__main__":
    key = jax.random.PRNGKey(0)
    k1, k2, k3, k4 = jax.random.split(key, 4)

    # 1) Small single-tile case (batch=8, embed_dim=32) -> fused path.
    B, D = 8, 32
    im = jax.random.normal(k1, (B, D), dtype=jnp.float32)
    s = jax.random.normal(k2, (B, D), dtype=jnp.float32)
    loss = contrastive_loss(im, s, margin=0.2)
    jax.block_until_ready(loss)
    ref = contrastive_loss_ref(im, s, margin=0.2)
    assert jnp.allclose(loss, ref, rtol=5e-3, atol=1e-3), (loss, ref)

    # 2) Multi-tile k-tiled path (accumulator scratch + cross-tile masking).
    B2, D2 = 256, 256
    im2 = jax.random.normal(k3, (B2, D2), dtype=jnp.float32)
    s2 = jax.random.normal(k4, (B2, D2), dtype=jnp.float32)
    loss2 = contrastive_loss(im2, s2, margin=0.2, block_b=128, block_k=128)
    jax.block_until_ready(loss2)
    ref2 = contrastive_loss_ref(im2, s2, margin=0.2)
    assert jnp.allclose(loss2, ref2, rtol=5e-3, atol=1e-3), (loss2, ref2)

    # 3) Multi-tile fused path (tk = D, resident im panel, i==j / i!=j branches).
    loss3 = contrastive_loss(im2, s2, margin=0.2, block_b=128)
    jax.block_until_ready(loss3)
    assert jnp.allclose(loss3, ref2, rtol=5e-3, atol=1e-3), (loss3, ref2)

    # 4) bf16-operand path (compare against a reference on bf16-rounded inputs).
    loss4 = contrastive_loss(im2, s2, margin=0.2, cast_to_bf16=True)
    jax.block_until_ready(loss4)
    ref4 = contrastive_loss_ref(im2.astype(jnp.bfloat16).astype(jnp.float32),
                                s2.astype(jnp.bfloat16).astype(jnp.float32),
                                margin=0.2)
    assert jnp.allclose(loss4, ref4, rtol=5e-3, atol=1e-3), (loss4, ref4)

    print("KERNEL_OK")
</pallas_src>

<mosaic_0001>
module attributes {stable_mosaic.version = 11 : i64} {
  func.func @_pairwise_diag_kernel(%arg0: i32, %arg1: i32, %arg2: memref<8x32xf32, #tpu.memory_space<vmem>>, %arg3: memref<8x32xf32, #tpu.memory_space<vmem>>, %arg4: memref<8x1xf32, #tpu.memory_space<vmem>>) attributes {dimension_semantics = [#tpu.dimension_semantics<parallel>, #tpu.dimension_semantics<arbitrary>], iteration_bounds = array<i64: 1, 1>, scalar_prefetch = 0 : i64, scratch_operands = 0 : i64, tpu.core_type = #tpu.core_type<tc>, window_params = [{transform_indices = @transform_0, window_bounds = array<i64: 8, 32>}, {transform_indices = @transform_1, window_bounds = array<i64: 8, 32>}, {transform_indices = @transform_2, window_bounds = array<i64: 8, 1>}]} {
    %c0_i32 = arith.constant 0 : i32
    %0 = arith.cmpi eq, %arg1, %c0_i32 : i32
    %1 = arith.extui %0 : i1 to i32
    %c0_i32_0 = arith.constant 0 : i32
    %2 = arith.cmpi ne, %1, %c0_i32_0 : i32
    scf.if %2 {
      %cst_8 = arith.constant 0.000000e+00 : f32
      %11 = vector.broadcast %cst_8 : f32 to vector<8x1xf32>
      %c0_9 = arith.constant 0 : index
      %c0_10 = arith.constant 0 : index
      %12 = vector.load %arg4[%c0_9, %c0_10] : memref<8x1xf32, #tpu.memory_space<vmem>>, vector<8x1xf32>
      tpu.vector_store %arg4[%c0_9, %c0_10], %11 {strides = array<i32>} : memref<8x1xf32, #tpu.memory_space<vmem>>, vector<8x1xf32>,
    } else {
    }
    %c0 = arith.constant 0 : index
    %c0_1 = arith.constant 0 : index
    %3 = vector.load %arg4[%c0, %c0_1] : memref<8x1xf32, #tpu.memory_space<vmem>>, vector<8x1xf32>
    %c0_2 = arith.constant 0 : index
    %c0_3 = arith.constant 0 : index
    %4 = vector.load %arg2[%c0_2, %c0_3] : memref<8x32xf32, #tpu.memory_space<vmem>>, vector<8x32xf32>
    %c0_4 = arith.constant 0 : index
    %c0_5 = arith.constant 0 : index
    %5 = vector.load %arg3[%c0_4, %c0_5] : memref<8x32xf32, #tpu.memory_space<vmem>>, vector<8x32xf32>
    %6 = arith.mulf %4, %5 : vector<8x32xf32>
    %cst = arith.constant dense<0.000000e+00> : vector<8xf32>
    %7 = vector.multi_reduction <add>, %6, %cst [1] : vector<8x32xf32> to vector<8xf32>
    %8 = vector.shape_cast %7 : vector<8xf32> to vector<8x1xf32>
    %9 = arith.addf %3, %8 : vector<8x1xf32>
    %c0_6 = arith.constant 0 : index
    %c0_7 = arith.constant 0 : index
    %10 = vector.load %arg4[%c0_6, %c0_7] : memref<8x1xf32, #tpu.memory_space<vmem>>, vector<8x1xf32>
    tpu.vector_store %arg4[%c0_6, %c0_7], %9 {strides = array<i32>} : memref<8x1xf32, #tpu.memory_space<vmem>>, vector<8x1xf32>,
    return
  }
  func.func @transform_0(%arg0: i32, %arg1: i32) -> (i32, i32) {
    %c0_i32 = arith.constant 0 : i32
    return %arg0, %arg1 : i32, i32
  }
  func.func @transform_1(%arg0: i32, %arg1: i32) -> (i32, i32) {
    %c0_i32 = arith.constant 0 : i32
    return %arg0, %arg1 : i32, i32
  }
  func.func @transform_2(%arg0: i32, %arg1: i32) -> (i32, i32) {
    %c0_i32 = arith.constant 0 : i32
    %c0_i32_0 = arith.constant 0 : i32
    return %arg0, %c0_i32 : i32, i32
  }
}

</mosaic_0001>

<bundles_post_ra>
// kernel: tpu_custom_call.1
= control target key start
LH: loop header
LB: loop body
LE: loop exit
PB: predicated region body
PF: predicated region fallthrough
CT: control target
= control target key end

     0   :  { %7 = vsyncpa [#allocation3], 0  ;;  %s160_s0 = inlined_call_operand.hbm [shape: f32[8,32], index: 0, kind: input, shape index: {}]   ;;  %s161_s1 = inlined_call_operand.hbm [shape: f32[8,32], index: 1, kind: input, shape index: {}]   ;;  %s162_s2 = inlined_call_operand.vmem [shape: f32[8,1], index: 2, kind: output, shape index: {}]  }
   0x1   :  { %8 = vsyncpa [#allocation5], 0  ;;  %s109_s9 = smov [#allocation2]   ;;  %s110_s11 = smov [#allocation4]  }
   0x2   :  { %s15_s10 = sshll.u32 %s109_s9, 4  ;;  %s25_s12 = sshll.u32 %s110_s11, 4  ;;  %s16_s10 = int_to_ptr.vmem [resolvable:$true] %s15_s10  ;;  %s26_s12 = int_to_ptr.vmem [resolvable:$true] %s25_s12 }
   0x3   :  { %s61_s15 = scalar_lea.hbm %s160_s0, 128 }
   0x4   :  { %p62_p0 = scmp.ne.s32.totalorder %s160_s0, %s61_s15  ;;  %p65_p1 = scmp.lt.u32.totalorder %s61_s15, %s160_s0 }
   0x6   :  { %p67_p2 = pnand %p65_p1, %p62_p0 }
   0x8   :  { %70 = shalt.err (!%p67_p2)
}
   0x9   :  { %s71_s20 = scalar_lea.vmem %s16_s10, 128  ;;  %p76_p4 = scmp.lt.s32.totalorder %s16_s10, %s16_s10 }
   0xa   :  { %p72_p3 = scmp.ne.s32.totalorder %s16_s10, %s71_s20  ;;  %p77_p5 = scmp.lt.s32.totalorder %s71_s20, %s71_s20 }
   0xc   :  { %p78_p6 = por %p77_p5, %p76_p4 }
   0xe   :  { %p79_p7 = pnand %p78_p6, %p72_p3 }
  0x10   :  { %82 = shalt.err (!%p79_p7)
}
  0x11   :  { %18 = dma.hbm_to_vmem [thread:$0]  %s160_s0, 128, %s16_s10, [#allocation3]  }
  0x12   :  { %s83_s25 = scalar_lea.hbm %s161_s1, 128 }
  0x13   :  { %p84_p8 = scmp.ne.s32.totalorder %s161_s1, %s83_s25  ;;  %p87_p9 = scmp.lt.u32.totalorder %s83_s25, %s161_s1 }
  0x15   :  { %p89_p10 = pnand %p87_p9, %p84_p8 }
  0x17   :  { %92 = shalt.err (!%p89_p10)
}
  0x18   :  { %s93_s30 = scalar_lea.vmem %s26_s12, 128  ;;  %p98_p12 = scmp.lt.s32.totalorder %s26_s12, %s26_s12 }
  0x19   :  { %p94_p11 = scmp.ne.s32.totalorder %s26_s12, %s93_s30  ;;  %p99_p13 = scmp.lt.s32.totalorder %s93_s30, %s93_s30 }
  0x1b   :  { %p100_p0 = por %p99_p13, %p98_p12 }
  0x1d   :  { %p101_p1 = pnand %p100_p0, %p94_p11 }
  0x1f   :  { %104 = shalt.err (!%p101_p1)
}
  0x20   :  { %28 = dma.hbm_to_vmem [thread:$0]  %s161_s1, 128, %s26_s12, [#allocation5]  }
  0x21   :  { %105 = dma.done.wait [#allocation3], 128  }
  0x22   :  { %106 = vsyncadd [#allocation3], 4294967168 }
  0x23   :  { %107 = dma.done.wait [#allocation5], 128  }
  0x24   :  { %108 = vsyncadd [#allocation5], 4294967168  ;;  %vm39_vm0 = vcmask 7168   ;;  %v111_v0 = vmov 0.0   ;;  %v42_v1 = vld [vmem:[#allocation2] sm:$0xff]  ;;  %v43_v2 = vld [vmem:[#allocation4] sm:$0xff] }
  0x25   :  { %40 = vst.msk [vmem:[%s162_s2] sm:$0xff] %vm39_vm0, %v111_v0  ;;  %vm45_vm1 = vcmask 261120   ;;  %v44_v3 = vmul.f32 %v43_v2, %v42_v1 }
  0x27   :  { %v46_v4 = vsel %vm45_vm1, %v44_v3, 0.0 }
  0x28   :  { %47 = vadd.xlane.f32.xlu0 %v46_v4 }
  0x2c   :  { %v41_v5 = vld [vmem:[%s162_s2] sm:$0xff] }
  0xb5   :  { %v48_v6 = vpop.xlane.xlu0 %47 }
  0xb6   :  { %v49_v7 = vadd.f32 %v48_v6, %v41_v5 }
  0xb8   :  { %51 = vst.msk [vmem:[%s162_s2] sm:$0xff] %vm39_vm0, %v49_v7 }
  0xb9   :  { %56 = vsyncpa [#allocation3], 1 }
  0xba   :  { %57 = vsyncpa [#allocation5], 1 }

</bundles_post_ra>
